<compile_context>
chip_gen: v7x
topology: tpu7x:2x2x1
jax: 0.10.0
libtpu: 0.0.40
codegen_flags: <defaults>
</compile_context>

<pallas_src>
import functools

import jax
import jax.numpy as jnp
import numpy as np
from jax.experimental import pallas as pl
from jax.experimental.pallas import tpu as pltpu


def _project_kernel(x_ref, w_ref, he_ref):
    # he = x @ [W | W a1^T | W a2^T]  (one MXU matmul, single grid step).
    he_ref[...] = jnp.dot(
        x_ref[...], w_ref[...], preferred_element_type=jnp.float32
    ).astype(he_ref.dtype)


def _gat_attention_kernel(f1_ref, f2_ref, adj_ref, h_ref, out_ref,
                          rowsum_acc, agg_acc, *, alpha, concat, matmul_dtype):
    j = pl.program_id(1)

    @pl.when(j == 0)
    def _init():
        rowsum_acc[...] = jnp.zeros_like(rowsum_acc)
        agg_acc[...] = jnp.zeros_like(agg_acc)

    # Attention logits for this (row_block, col_block) tile:
    #   s[i, j] = a1 . h_i + a2 . h_j   (f1 / f2 precomputed by kernel 1).
    s = f1_ref[...] + f2_ref[...]                 # (TR,1)+(1,TC) -> (TR,TC)
    s = jnp.where(s > 0.0, s, alpha * s)          # LeakyReLU(alpha)

    # Mask BEFORE the exp so non-edges cannot overflow: exp(-1e30) == 0.
    neg_s = jnp.where(adj_ref[...] != 0, -s, jnp.float32(-1e30))
    e = jnp.exp(neg_s)                            # (TR, TC); exactly 0 off-edge

    rowsum_acc[...] += jnp.sum(e, axis=1, keepdims=True)
    agg_acc[...] += jnp.dot(
        e.astype(matmul_dtype), h_ref[...].astype(matmul_dtype),
        preferred_element_type=jnp.float32)

    @pl.when(j == pl.num_programs(1) - 1)
    def _finalize():
        # One reciprocal per row (EUP slot) + broadcast multiply instead of a
        # full (TR, F_out) vector divide on the VALU.
        h_prime = agg_acc[...] * pl.reciprocal(rowsum_acc[...], approx=True)
        if concat:
            # F.elu: x if x > 0 else exp(x) - 1
            h_prime = jnp.where(h_prime > 0.0, h_prime, jnp.exp(h_prime) - 1.0)
        out_ref[...] = h_prime.astype(out_ref.dtype)


def sp_graph_attention_forward(x, adj, W, a, *, alpha=0.2, concat=True,
                               row_block=256, col_block=256,
                               matmul_dtype=jnp.float32):
    """x: (N, F_in) node features, adj: (N, N) adjacency (nonzero => edge,
    any dtype), W: (F_in, F_out), a: (1, 2*F_out). Returns (N, F_out) f32."""
    N, F_in = x.shape
    F_out = W.shape[1]

    row_block = min(row_block, N)
    col_block = min(col_block, N)
    assert N % row_block == 0 and N % col_block == 0, "N must tile evenly"
    assert row_block % 32 == 0 or row_block == N, "row_block must be 32-aligned"
    assert col_block % 128 == 0 or col_block == N, "col_block must be 128-aligned"

    # Fold the two width-1 attention matmuls into the projection.
    a1 = a[:, :F_out]                      # (1, F_out)  source half
    a2 = a[:, F_out:]                      # (1, F_out)  target half
    W_ext = jnp.concatenate([W, W @ a1.T, W @ a2.T], axis=1)  # (F_in, F_out+2)
    F_ext = F_out + 2

    # ---- kernel 1: extended projection he = x @ W_ext, one grid step ----
    he = pl.pallas_call(
        _project_kernel,
        out_shape=jax.ShapeDtypeStruct((N, F_ext), jnp.float32),
        grid_spec=pltpu.PrefetchScalarGridSpec(
            num_scalar_prefetch=0,
            grid=(1,),
            in_specs=[
                pl.BlockSpec((N, F_in), lambda i: (0, 0)),
                pl.BlockSpec((F_in, F_ext), lambda i: (0, 0)),
            ],
            out_specs=pl.BlockSpec((N, F_ext), lambda i: (0, 0)),
        ),
        compiler_params=pltpu.CompilerParams(
            dimension_semantics=("arbitrary",)),
    )(x.astype(matmul_dtype), W_ext.astype(matmul_dtype))

    h = he[:, :F_out]                          # (N, F_out) projected features
    f1 = he[:, F_out:F_out + 1]                # (N, 1)  a1 . h_i
    f2 = he[:, F_out + 1:].reshape(1, N)       # (1, N)  a2 . h_j

    # int8 adjacency mask: 4x less HBM traffic / VMEM than f32.
    adj_mask = adj if adj.dtype == jnp.int8 else (adj != 0).astype(jnp.int8)

    # VMEM footprint of kernel 2 (double-buffered inputs/output + scratch).
    vmem_bytes = (
        2 * row_block * 4                      # f1
        + 2 * col_block * 4                    # f2
        + 2 * row_block * col_block            # adj (int8)
        + 2 * col_block * F_out * 4            # h column block
        + 2 * row_block * F_out * 4            # out
        + row_block * 4 + row_block * F_out * 4)  # accumulators
    vmem_limit = int(min(100 * 2**20, max(16 * 2**20, 2 * vmem_bytes)))

    # ---- kernel 2: fused masked attention + aggregation + normalize + ELU ----
    grid = (N // row_block, N // col_block)
    out = pl.pallas_call(
        functools.partial(_gat_attention_kernel, alpha=alpha, concat=concat,
                          matmul_dtype=matmul_dtype),
        out_shape=jax.ShapeDtypeStruct((N, F_out), jnp.float32),
        grid_spec=pltpu.PrefetchScalarGridSpec(
            num_scalar_prefetch=0,
            grid=grid,
            in_specs=[
                pl.BlockSpec((row_block, 1), lambda i, j: (i, 0)),          # f1
                pl.BlockSpec((1, col_block), lambda i, j: (0, j)),          # f2
                pl.BlockSpec((row_block, col_block), lambda i, j: (i, j)),  # adj
                pl.BlockSpec((col_block, F_out), lambda i, j: (j, 0)),      # h
            ],
            out_specs=pl.BlockSpec((row_block, F_out), lambda i, j: (i, 0)),
            scratch_shapes=[
                pltpu.VMEM((row_block, 1), jnp.float32),       # rowsum acc
                pltpu.VMEM((row_block, F_out), jnp.float32),   # e @ h acc
            ],
        ),
        compiler_params=pltpu.CompilerParams(
            dimension_semantics=("parallel", "arbitrary"),
            vmem_limit_bytes=vmem_limit),
    )(f1, f2, adj_mask, h)

    return out


def sp_graph_attention_reference(x, adj, W, a, alpha=0.2, concat=True):
    """Pure-numpy (float64) reference mirroring the PyTorch module exactly
    (eval mode, dropout = identity)."""
    x = np.asarray(x, np.float64)
    adj = np.asarray(adj, np.float64)
    W = np.asarray(W, np.float64)
    a = np.asarray(a, np.float64)
    F_out = W.shape[1]

    h = x @ W
    f1 = h @ a[0, :F_out].reshape(-1, 1)
    f2 = h @ a[0, F_out:].reshape(-1, 1)
    s = f1 + f2.T
    s = np.where(s > 0, s, alpha * s)                  # LeakyReLU
    e = np.where(adj != 0, np.exp(-s), 0.0)            # edge_e on edges only
    rowsum = e.sum(axis=1, keepdims=True)              # e_rowsum
    h_prime = (e @ h) / rowsum
    if concat:
        h_prime = np.where(h_prime > 0, h_prime, np.exp(h_prime) - 1.0)  # ELU
    return h_prime


if __name__ == "__main__":
    N, F_in, F_out = 256, 16, 64
    alpha = 0.2

    key = jax.random.PRNGKey(0)
    kx, kw, ka, kadj = jax.random.split(key, 4)

    x = jax.random.normal(kx, (N, F_in), jnp.float32)

    # xavier_normal_ with gain=1.414
    w_std = float(1.414 * np.sqrt(2.0 / (F_in + F_out)))
    a_std = float(1.414 * np.sqrt(2.0 / (1 + 2 * F_out)))
    W = w_std * jax.random.normal(kw, (F_in, F_out), jnp.float32)
    a = a_std * jax.random.normal(ka, (1, 2 * F_out), jnp.float32)

    # Sparse random adjacency (int8 mask) with guaranteed self-loops so no row
    # is empty, matching the module's assumption that e_rowsum has no zeros.
    adj = (jax.random.uniform(kadj, (N, N)) < 0.15).astype(jnp.int8)
    adj = jnp.maximum(adj, jnp.eye(N, dtype=jnp.int8))

    out = jax.block_until_ready(
        sp_graph_attention_forward(x, adj, W, a, alpha=alpha, concat=True,
                                   row_block=128, col_block=128))

    ref = sp_graph_attention_reference(x, adj, W, a, alpha=alpha, concat=True)
    # f32 matmul accumulation is kept; tolerance leaves headroom for the
    # approximate EUP reciprocal used for the row normalizer.
    np.testing.assert_allclose(np.asarray(out), ref, rtol=2e-2, atol=2e-2)

    print("KERNEL_OK")
</pallas_src>

<mosaic_0001>
module attributes {stable_mosaic.version = 11 : i64} {
  func.func @_project_kernel(%arg0: i32, %arg1: memref<256x16xf32, #tpu.memory_space<vmem>>, %arg2: memref<16x66xf32, #tpu.memory_space<vmem>>, %arg3: memref<256x66xf32, #tpu.memory_space<vmem>>) attributes {dimension_semantics = [#tpu.dimension_semantics<arbitrary>], iteration_bounds = array<i64: 1>, scalar_prefetch = 0 : i64, scratch_operands = 0 : i64, tpu.core_type = #tpu.core_type<tc>, window_params = [{pipeline_mode = #tpu.pipeline_mode<synchronous>, transform_indices = @transform_0, window_bounds = array<i64: 256, 16>}, {pipeline_mode = #tpu.pipeline_mode<synchronous>, transform_indices = @transform_1, window_bounds = array<i64: 16, 66>}, {pipeline_mode = #tpu.pipeline_mode<synchronous>, transform_indices = @transform_2, window_bounds = array<i64: 256, 66>}]} {
    %c0 = arith.constant 0 : index
    %c0_0 = arith.constant 0 : index
    %0 = vector.load %arg1[%c0, %c0_0] : memref<256x16xf32, #tpu.memory_space<vmem>>, vector<256x16xf32>
    %c0_1 = arith.constant 0 : index
    %c0_2 = arith.constant 0 : index
    %1 = vector.load %arg2[%c0_1, %c0_2] : memref<16x66xf32, #tpu.memory_space<vmem>>, vector<16x66xf32>
    %cst = arith.constant dense<0.000000e+00> : vector<256x66xf32>
    %2 = tpu.matmul %0, %1, %cst {dimension_numbers = #tpu.dot_dimension_numbers<[1], [0], [0], [1], [0, 0, 1, 1], [], []>} : vector<256x16xf32>, vector<16x66xf32>, vector<256x66xf32> -> vector<256x66xf32>
    %c0_3 = arith.constant 0 : index
    %c0_4 = arith.constant 0 : index
    %3 = vector.load %arg3[%c0_3, %c0_4] : memref<256x66xf32, #tpu.memory_space<vmem>>, vector<256x66xf32>
    tpu.vector_store %arg3[%c0_3, %c0_4], %2 {strides = array<i32>} : memref<256x66xf32, #tpu.memory_space<vmem>>, vector<256x66xf32>,
    return
  }
  func.func @transform_0(%arg0: i32) -> (i32, i32) {
    %c0_i32 = arith.constant 0 : i32
    %c0_i32_0 = arith.constant 0 : i32
    %c0_i32_1 = arith.constant 0 : i32
    return %c0_i32, %c0_i32_0 : i32, i32
  }
  func.func @transform_1(%arg0: i32) -> (i32, i32) {
    %c0_i32 = arith.constant 0 : i32
    %c0_i32_0 = arith.constant 0 : i32
    %c0_i32_1 = arith.constant 0 : i32
    return %c0_i32, %c0_i32_0 : i32, i32
  }
  func.func @transform_2(%arg0: i32) -> (i32, i32) {
    %c0_i32 = arith.constant 0 : i32
    %c0_i32_0 = arith.constant 0 : i32
    %c0_i32_1 = arith.constant 0 : i32
    return %c0_i32, %c0_i32_0 : i32, i32
  }
}

</mosaic_0001>

<bundles_post_ra>
// kernel: tpu_custom_call.1
= control target key start
LH: loop header
LB: loop body
LE: loop exit
PB: predicated region body
PF: predicated region fallthrough
CT: control target
= control target key end

     0   :  { %vm45_vm0 = vcmask 130048   ;;  %vm367_vm1 = vcmask 539648   ;;  %s805_s1 = inlined_call_operand.vmem [shape: f32[16,66], index: 1, kind: input, shape index: {}]   ;;  %s806_s0 = inlined_call_operand.vmem [shape: f32[256,16], index: 0, kind: input, shape index: {}]   ;;  %s807_s2 = inlined_call_operand.vmem [shape: f32[256,66], index: 2, kind: output, shape index: {}]  }
   0x1   :  { %v43_v0 = vld [vmem:[%s805_s1] sm:$0xff]  ;;  %v44_v1 = vld [vmem:[%s805_s1 + $0x8] sm:$0xff]  ;;  %v13_v7 = vld [vmem:[%s806_s0 + $0x10] sm:$0xff] }
   0x2   :  { %v11_v2 = vld [vmem:[%s806_s0] sm:$0xff]  ;;  %v522_v3 = vpack.c.bf16 %v44_v1, %v43_v0  ;;  %v12_v5 = vld [vmem:[%s806_s0 + $0x8] sm:$0xff]  ;;  %v29_v8 = vld [vmem:[%s806_s0 + $0x90] sm:$0xff] }
   0x3   :  { %474 = vmatprep.mubr.msk.f32.mxu0 %vm45_vm0, %v11_v2  ;;  %v27_v4 = vld [vmem:[%s806_s0 + $0x80] sm:$0xff]  ;;  %v28_v6 = vld [vmem:[%s806_s0 + $0x88] sm:$0xff]  ;;  %v14_v9 = vld [vmem:[%s806_s0 + $0x18] sm:$0xff] }
   0x4   :  { %498 = vmatprep.mubr.msk.f32.mxu1 %vm45_vm0, %v27_v4  ;;  %523 = vmatprep.subr.bf16.mxu0 %v522_v3  ;;  %v30_v10 = vld [vmem:[%s806_s0 + $0x98] sm:$0xff]  ;;  %v15_v11 = vld [vmem:[%s806_s0 + $0x20] sm:$0xff]  ;;  %v16_v13 = vld [vmem:[%s806_s0 + $0x28] sm:$0xff] }
   0x5   :  { %526 = vmatprep.subr.bf16.mxu1 %v522_v3  ;;  %525 = vmatpush3.bf16.msra.mxu0 %v522_v3  ;;  %v31_v12 = vld [vmem:[%s806_s0 + $0xa0] sm:$0xff]  ;;  %v32_v14 = vld [vmem:[%s806_s0 + $0xa8] sm:$0xff]  ;;  %v17_v15 = vld [vmem:[%s806_s0 + $0x30] sm:$0xff] }
   0x6   :  { %527 = vmatpush3.bf16.msra.mxu1 %v522_v3  ;;  %v33_v16 = vld [vmem:[%s806_s0 + $0xb0] sm:$0xff]  ;;  %v18_v17 = vld [vmem:[%s806_s0 + $0x38] sm:$0xff]  ;;  %v19_v19 = vld [vmem:[%s806_s0 + $0x40] sm:$0xff] }
   0x7   :  { %v34_v18 = vld [vmem:[%s806_s0 + $0xb8] sm:$0xff]  ;;  %v35_v20 = vld [vmem:[%s806_s0 + $0xc0] sm:$0xff]  ;;  %v20_v21 = vld [vmem:[%s806_s0 + $0x48] sm:$0xff] }
   0x8   :  { %475 = vmatmul.mubr.msk.f32.vlgmr.msra.gmra.mrb[0].mxu0 %vm45_vm0, %v12_v5  ;;  %v36_v22 = vld [vmem:[%s806_s0 + $0xc8] sm:$0xff]  ;;  %v21_v23 = vld [vmem:[%s806_s0 + $0x50] sm:$0xff]  ;;  %v22_v25 = vld [vmem:[%s806_s0 + $0x58] sm:$0xff] }
   0x9   :  { %499 = vmatmul.mubr.msk.f32.vlgmr.msra.gmra.mrb[0].mxu1 %vm45_vm0, %v28_v6  ;;  %477 = vmatprep.mubr.msk.f32.mxu0 %vm45_vm0, %v13_v7  ;;  %v37_v24 = vld [vmem:[%s806_s0 + $0xd0] sm:$0xff]  ;;  %v38_v26 = vld [vmem:[%s806_s0 + $0xd8] sm:$0xff]  ;;  %v23_v27 = vld [vmem:[%s806_s0 + $0x60] sm:$0xff] }
   0xa   :  { %501 = vmatprep.mubr.msk.f32.mxu1 %vm45_vm0, %v29_v8  ;;  %v39_v28 = vld [vmem:[%s806_s0 + $0xe0] sm:$0xff]  ;;  %v24_v29 = vld [vmem:[%s806_s0 + $0x68] sm:$0xff]  ;;  %v25_v31 = vld [vmem:[%s806_s0 + $0x70] sm:$0xff] }
   0xb   :  { %v40_v30 = vld [vmem:[%s806_s0 + $0xe8] sm:$0xff]  ;;  %v41_v32 = vld [vmem:[%s806_s0 + $0xf0] sm:$0xff]  ;;  %v26_v33 = vld [vmem:[%s806_s0 + $0x78] sm:$0xff] }
   0xc   :  { %478 = vmatmul.mubr.msk.f32.gmra.mrb[2].mxu0 %vm45_vm0, %v14_v9  ;;  %v42_v34 = vld [vmem:[%s806_s0 + $0xf8] sm:$0xff] }
   0xd   :  { %502 = vmatmul.mubr.msk.f32.gmra.mrb[2].mxu1 %vm45_vm0, %v30_v10  ;;  %480 = vmatprep.mubr.msk.f32.mxu0 %vm45_vm0, %v15_v11 }
   0xe   :  { %504 = vmatprep.mubr.msk.f32.mxu1 %vm45_vm0, %v31_v12 }
  0x10   :  { %481 = vmatmul.mubr.msk.f32.gmra.mrb[4].mxu0 %vm45_vm0, %v16_v13 }
  0x11   :  { %505 = vmatmul.mubr.msk.f32.gmra.mrb[4].mxu1 %vm45_vm0, %v32_v14  ;;  %483 = vmatprep.mubr.msk.f32.mxu0 %vm45_vm0, %v17_v15 }
  0x12   :  { %507 = vmatprep.mubr.msk.f32.mxu1 %vm45_vm0, %v33_v16 }
  0x14   :  { %484 = vmatmul.mubr.msk.f32.gmra.mrb[6].mxu0 %vm45_vm0, %v18_v17 }
  0x15   :  { %508 = vmatmul.mubr.msk.f32.gmra.mrb[6].mxu1 %vm45_vm0, %v34_v18  ;;  %486 = vmatprep.mubr.msk.f32.mxu0 %vm45_vm0, %v19_v19 }
  0x16   :  { %510 = vmatprep.mubr.msk.f32.mxu1 %vm45_vm0, %v35_v20 }
  0x18   :  { %487 = vmatmul.mubr.msk.f32.gmra.mrb[8].mxu0 %vm45_vm0, %v20_v21 }
  0x19   :  { %511 = vmatmul.mubr.msk.f32.gmra.mrb[8].mxu1 %vm45_vm0, %v36_v22  ;;  %489 = vmatprep.mubr.msk.f32.mxu0 %vm45_vm0, %v21_v23 }
  0x1a   :  { %513 = vmatprep.mubr.msk.f32.mxu1 %vm45_vm0, %v37_v24 }
  0x1c   :  { %490 = vmatmul.mubr.msk.f32.gmra.mrb[10].mxu0 %vm45_vm0, %v22_v25 }
  0x1d   :  { %514 = vmatmul.mubr.msk.f32.gmra.mrb[10].mxu1 %vm45_vm0, %v38_v26  ;;  %492 = vmatprep.mubr.msk.f32.mxu0 %vm45_vm0, %v23_v27 }
  0x1e   :  { %516 = vmatprep.mubr.msk.f32.mxu1 %vm45_vm0, %v39_v28 }
  0x20   :  { %493 = vmatmul.mubr.msk.f32.gmra.mrb[12].mxu0 %vm45_vm0, %v24_v29 }
  0x21   :  { %517 = vmatmul.mubr.msk.f32.gmra.mrb[12].mxu1 %vm45_vm0, %v40_v30  ;;  %495 = vmatprep.mubr.msk.f32.mxu0 %vm45_vm0, %v25_v31 }
  0x22   :  { %519 = vmatprep.mubr.msk.f32.mxu1 %vm45_vm0, %v41_v32 }
  0x24   :  { %496 = vmatmul.mubr.msk.f32.gmra.mrb[14].mxu0 %vm45_vm0, %v26_v33 }
  0x25   :  { %520 = vmatmul.mubr.msk.f32.gmra.mrb[14].mxu1 %vm45_vm0, %v42_v34 }
  0xdb   :  { %v476_v35 = vpop.f32.mrb[0].mxu0 }
  0xdc   :  { %v500_v36 = vpop.f32.mrb[0].mxu1  ;;  %369 = vst.msk [vmem:[%s807_s2 + $0x8] sm:$0xff] %vm367_vm1, %v476_v35  ;;  %v208_v37 = vpop.f32.mrb[1].mxu0 }
  0xdd   :  { %385 = vst.msk [vmem:[%s807_s2 + $0x88] sm:$0xff] %vm367_vm1, %v500_v36  ;;  %v288_v38 = vpop.f32.mrb[1].mxu1  ;;  %368 = vst.msk [vmem:[%s807_s2] sm:$0xff] %vm367_vm1, %v208_v37 }
  0xde   :  { %384 = vst.msk [vmem:[%s807_s2 + $0x80] sm:$0xff] %vm367_vm1, %v288_v38 }
  0xdf   :  { %v479_v39 = vpop.f32.mrb[2].mxu0 }
  0xe0   :  { %v503_v40 = vpop.f32.mrb[2].mxu1  ;;  %371 = vst.msk [vmem:[%s807_s2 + $0x18] sm:$0xff] %vm367_vm1, %v479_v39  ;;  %v218_v41 = vpop.f32.mrb[3].mxu0 }
  0xe1   :  { %387 = vst.msk [vmem:[%s807_s2 + $0x98] sm:$0xff] %vm367_vm1, %v503_v40  ;;  %v298_v42 = vpop.f32.mrb[3].mxu1  ;;  %370 = vst.msk [vmem:[%s807_s2 + $0x10] sm:$0xff] %vm367_vm1, %v218_v41 }
  0xe2   :  { %386 = vst.msk [vmem:[%s807_s2 + $0x90] sm:$0xff] %vm367_vm1, %v298_v42 }
  0xe3   :  { %v482_v43 = vpop.f32.mrb[4].mxu0 }
  0xe4   :  { %v506_v44 = vpop.f32.mrb[4].mxu1  ;;  %373 = vst.msk [vmem:[%s807_s2 + $0x28] sm:$0xff] %vm367_vm1, %v482_v43  ;;  %v228_v45 = vpop.f32.mrb[5].mxu0 }
  0xe5   :  { %389 = vst.msk [vmem:[%s807_s2 + $0xa8] sm:$0xff] %vm367_vm1, %v506_v44  ;;  %v308_v46 = vpop.f32.mrb[5].mxu1  ;;  %372 = vst.msk [vmem:[%s807_s2 + $0x20] sm:$0xff] %vm367_vm1, %v228_v45 }
  0xe6   :  { %388 = vst.msk [vmem:[%s807_s2 + $0xa0] sm:$0xff] %vm367_vm1, %v308_v46 }
  0xe7   :  { %v485_v47 = vpop.f32.mrb[6].mxu0 }
  0xe8   :  { %v509_v48 = vpop.f32.mrb[6].mxu1  ;;  %375 = vst.msk [vmem:[%s807_s2 + $0x38] sm:$0xff] %vm367_vm1, %v485_v47  ;;  %v238_v49 = vpop.f32.mrb[7].mxu0 }
  0xe9   :  { %391 = vst.msk [vmem:[%s807_s2 + $0xb8] sm:$0xff] %vm367_vm1, %v509_v48  ;;  %v318_v50 = vpop.f32.mrb[7].mxu1  ;;  %374 = vst.msk [vmem:[%s807_s2 + $0x30] sm:$0xff] %vm367_vm1, %v238_v49 }
  0xea   :  { %390 = vst.msk [vmem:[%s807_s2 + $0xb0] sm:$0xff] %vm367_vm1, %v318_v50 }
  0xeb   :  { %v488_v51 = vpop.f32.mrb[8].mxu0 }
  0xec   :  { %v512_v52 = vpop.f32.mrb[8].mxu1  ;;  %377 = vst.msk [vmem:[%s807_s2 + $0x48] sm:$0xff] %vm367_vm1, %v488_v51  ;;  %v248_v53 = vpop.f32.mrb[9].mxu0 }
  0xed   :  { %393 = vst.msk [vmem:[%s807_s2 + $0xc8] sm:$0xff] %vm367_vm1, %v512_v52  ;;  %v328_v54 = vpop.f32.mrb[9].mxu1  ;;  %376 = vst.msk [vmem:[%s807_s2 + $0x40] sm:$0xff] %vm367_vm1, %v248_v53 }
  0xee   :  { %392 = vst.msk [vmem:[%s807_s2 + $0xc0] sm:$0xff] %vm367_vm1, %v328_v54 }
  0xef   :  { %v491_v55 = vpop.f32.mrb[10].mxu0 }
  0xf0   :  { %v515_v56 = vpop.f32.mrb[10].mxu1  ;;  %379 = vst.msk [vmem:[%s807_s2 + $0x58] sm:$0xff] %vm367_vm1, %v491_v55  ;;  %v258_v57 = vpop.f32.mrb[11].mxu0 }
  0xf1   :  { %395 = vst.msk [vmem:[%s807_s2 + $0xd8] sm:$0xff] %vm367_vm1, %v515_v56  ;;  %v338_v58 = vpop.f32.mrb[11].mxu1  ;;  %378 = vst.msk [vmem:[%s807_s2 + $0x50] sm:$0xff] %vm367_vm1, %v258_v57 }
  0xf2   :  { %394 = vst.msk [vmem:[%s807_s2 + $0xd0] sm:$0xff] %vm367_vm1, %v338_v58 }
  0xf3   :  { %v494_v59 = vpop.f32.mrb[12].mxu0 }
  0xf4   :  { %v518_v60 = vpop.f32.mrb[12].mxu1  ;;  %381 = vst.msk [vmem:[%s807_s2 + $0x68] sm:$0xff] %vm367_vm1, %v494_v59  ;;  %v268_v61 = vpop.f32.mrb[13].mxu0 }
  0xf5   :  { %397 = vst.msk [vmem:[%s807_s2 + $0xe8] sm:$0xff] %vm367_vm1, %v518_v60  ;;  %v348_v62 = vpop.f32.mrb[13].mxu1  ;;  %380 = vst.msk [vmem:[%s807_s2 + $0x60] sm:$0xff] %vm367_vm1, %v268_v61 }
  0xf6   :  { %396 = vst.msk [vmem:[%s807_s2 + $0xe0] sm:$0xff] %vm367_vm1, %v348_v62 }
  0xf7   :  { %v497_v63 = vpop.f32.mrb[14].mxu0 }
  0xf8   :  { %v521_v0 = vpop.f32.mrb[14].mxu1  ;;  %383 = vst.msk [vmem:[%s807_s2 + $0x78] sm:$0xff] %vm367_vm1, %v497_v63  ;;  %v278_v1 = vpop.f32.mrb[15].mxu0 }
  0xf9   :  { %399 = vst.msk [vmem:[%s807_s2 + $0xf8] sm:$0xff] %vm367_vm1, %v521_v0  ;;  %v358_v2 = vpop.f32.mrb[15].mxu1  ;;  %382 = vst.msk [vmem:[%s807_s2 + $0x70] sm:$0xff] %vm367_vm1, %v278_v1 }
  0xfa   :  { %398 = vst.msk [vmem:[%s807_s2 + $0xf0] sm:$0xff] %vm367_vm1, %v358_v2 }

</bundles_post_ra>
